<compile_context>
chip_gen: v7x
topology: tpu7x:2x2x1
jax: 0.10.0
libtpu: 0.0.40
codegen_flags: <defaults>
</compile_context>

<pallas_src>
import functools

import jax
import jax.numpy as jnp
from jax import lax
from jax.experimental import pallas as pl
from jax.experimental.pallas import tpu as pltpu


def _fused_kernel(x_ref, mask_ref, w1_ref, w2_ref, vecs_ref, o_ref, *, bblk):
    """Fused conv1 + clamp/6 + conv2 + clamp/6 for one block of images.

    Lane-dense layout: channels on sublanes, flattened (padded) output pixels
    on lanes.
      x_ref:    (bblk, Cin,  Ppad)  stride-2 gathered x1 (0 where conv1 pads)
      mask_ref: (1, Ppad)           1.0 where conv2 reads v4, 0.0 on its pad ring
      w1_ref:   (Cout, Cin)         conv1 1x1 weights
      w2_ref:   (Cout, Cout)        conv2 1x1 weights
      vecs_ref: (Cout, 3)           [ x2 | b1 | b2 ] per-channel columns
      o_ref:    (bblk, Cout, Ppad)
    """
    m = mask_ref[...]                       # (1, Ppad)
    w1 = w1_ref[...]                        # (Cout, Cin)
    w2 = w2_ref[...]                        # (Cout, Cout)
    vecs = vecs_ref[...]                    # (Cout, 3)
    x2c = vecs[:, 0:1]                      # (Cout, 1)
    b1c = vecs[:, 1:2]                      # (Cout, 1)
    b2c = vecs[:, 2:3]                      # (Cout, 1)

    for b in range(bblk):                   # short static unroll over images
        x = x_ref[b]                        # (Cin, Ppad)
        # conv1 (1x1) as an MXU matmul; conv1 padding positions hold x == 0 so
        # they reduce to the bias-only value for free.
        v1 = jnp.dot(w1, x, preferred_element_type=jnp.float32) + b1c
        v4 = jnp.clip(x2c - v1, 0.0, 6.0) * (1.0 / 6.0)
        v4 = v4 * m                         # zero out conv2's padding ring
        # conv2 (1x1, stride handled by the gather) as an MXU matmul.
        v5 = jnp.dot(w2, v4, preferred_element_type=jnp.float32) + b2c
        o_ref[b] = jnp.clip(x2c - v5, 0.0, 6.0) * (1.0 / 6.0)


def model_forward(x1, x2, w1, b1, w2, b2):
    """x1: (B,3,H,W) NCHW, x2: (1,8,1,1). Returns (B,8,Ho,Wo) NCHW."""
    B, Cin, H, W = x1.shape
    Cout = w1.shape[0]

    # conv1 output is (H+2, W+2); conv2 (stride 2, pad 1) output:
    Ho = (H + 3) // 2 + 1
    Wo = (W + 3) // 2 + 1
    P = Ho * Wo
    Ppad = ((P + 127) // 128) * 128         # lane-dense: multiple of 128

    # Output pixel (ho, wo) with mask==1 reads v4 at (2*ho-1, 2*wo-1), which in
    # turn reads x1 at (2*(ho-1), 2*(wo-1)). Gather exactly those stride-2
    # samples; the zero border covers conv1's padding positions (bias-only).
    x1s = x1[:, :, ::2, ::2].astype(jnp.float32)            # (B,3,ceilH2,ceilW2)
    x1g = jnp.pad(x1s, ((0, 0), (0, 0), (1, 1), (1, 1)))     # (B,3,Ho,Wo)
    x1g = x1g.reshape(B, Cin, P)
    x1g = jnp.pad(x1g, ((0, 0), (0, 0), (0, Ppad - P)))      # lane pad to Ppad

    # Mask of output pixels where conv2 reads v4 (vs. its own zero padding).
    ho = jnp.arange(Ho)
    wo = jnp.arange(Wo)
    vh = (ho >= 1) & (ho <= (H + 2) // 2)
    vw = (wo >= 1) & (wo <= (W + 2) // 2)
    mask = (vh[:, None] & vw[None, :]).astype(jnp.float32).reshape(1, P)
    mask = jnp.pad(mask, ((0, 0), (0, Ppad - P)))

    w1m = w1.reshape(Cout, Cin).astype(jnp.float32)
    w2m = w2.reshape(Cout, Cout).astype(jnp.float32)
    vecs = jnp.concatenate(
        [x2.reshape(Cout, 1), b1.reshape(Cout, 1), b2.reshape(Cout, 1)],
        axis=1).astype(jnp.float32)

    # Pack as many images per grid step as fit a modest budget (fewest, largest
    # grid steps). At the test shapes this collapses to a single step.
    per_img_bytes = Cin * Ppad * 4
    bblk = max(1, min(B, 8, (1 << 20) // max(per_img_bytes, 1)))
    while B % bblk:
        bblk -= 1
    nblk = B // bblk

    kernel = functools.partial(_fused_kernel, bblk=bblk)
    out = pl.pallas_call(
        kernel,
        out_shape=jax.ShapeDtypeStruct((B, Cout, Ppad), jnp.float32),
        grid_spec=pltpu.PrefetchScalarGridSpec(
            num_scalar_prefetch=0,
            grid=(nblk,),
            in_specs=[
                pl.BlockSpec((bblk, Cin, Ppad), lambda i: (i, 0, 0)),
                pl.BlockSpec((1, Ppad), lambda i: (0, 0)),
                pl.BlockSpec((Cout, Cin), lambda i: (0, 0)),
                pl.BlockSpec((Cout, Cout), lambda i: (0, 0)),
                pl.BlockSpec((Cout, 3), lambda i: (0, 0)),
            ],
            out_specs=pl.BlockSpec((bblk, Cout, Ppad), lambda i: (i, 0, 0)),
        ),
        compiler_params=pltpu.CompilerParams(
            dimension_semantics=("parallel",)),
    )(x1g, mask, w1m, w2m, vecs)

    return out[:, :, :P].reshape(B, Cout, Ho, Wo)


def reference_forward(x1, x2, w1, b1, w2, b2):
    """Pure-JAX reference mirroring the PyTorch module (NCHW convs)."""
    dn = lax.conv_dimension_numbers(x1.shape, w1.shape, ("NCHW", "OIHW", "NCHW"))
    v1 = lax.conv_general_dilated(x1, w1, (1, 1), [(1, 1), (1, 1)],
                                  dimension_numbers=dn) + b1.reshape(1, -1, 1, 1)
    v4 = jnp.clip(x2 - v1, 0.0, 6.0) / 6.0
    dn2 = lax.conv_dimension_numbers(v4.shape, w2.shape, ("NCHW", "OIHW", "NCHW"))
    v5 = lax.conv_general_dilated(v4, w2, (2, 2), [(1, 1), (1, 1)],
                                  dimension_numbers=dn2) + b2.reshape(1, -1, 1, 1)
    return jnp.clip(x2 - v5, 0.0, 6.0) / 6.0


if __name__ == "__main__":
    key = jax.random.PRNGKey(0)
    k1, k2, k3, k4, k5, k6 = jax.random.split(key, 6)

    B, H, W = 2, 16, 16
    x1 = jax.random.normal(k1, (B, 3, H, W), dtype=jnp.float32)
    x2 = jax.random.normal(k2, (1, 8, 1, 1), dtype=jnp.float32)

    # Deterministic parameter init (shapes from the PyTorch module).
    w1 = 0.3 * jax.random.normal(k3, (8, 3, 1, 1), dtype=jnp.float32)
    b1 = 0.1 * jax.random.normal(k4, (8,), dtype=jnp.float32)
    w2 = 0.3 * jax.random.normal(k5, (8, 8, 1, 1), dtype=jnp.float32)
    b2 = 0.1 * jax.random.normal(k6, (8,), dtype=jnp.float32)

    out = jax.jit(model_forward)(x1, x2, w1, b1, w2, b2)
    out = jax.block_until_ready(out)

    ref = reference_forward(x1, x2, w1, b1, w2, b2)
    assert out.shape == ref.shape, (out.shape, ref.shape)
    assert jnp.allclose(out, ref, atol=1e-5, rtol=1e-5), "mismatch vs reference"

    print("KERNEL_OK")
</pallas_src>

<mosaic_0001>
module attributes {stable_mosaic.version = 11 : i64} {
  func.func @_fused_kernel(%arg0: i32, %arg1: memref<2x3x128xf32, #tpu.memory_space<vmem>>, %arg2: memref<1x128xf32, #tpu.memory_space<vmem>>, %arg3: memref<8x3xf32, #tpu.memory_space<vmem>>, %arg4: memref<8x8xf32, #tpu.memory_space<vmem>>, %arg5: memref<8x3xf32, #tpu.memory_space<vmem>>, %arg6: memref<2x8x128xf32, #tpu.memory_space<vmem>>) attributes {dimension_semantics = [#tpu.dimension_semantics<parallel>], iteration_bounds = array<i64: 1>, scalar_prefetch = 0 : i64, scratch_operands = 0 : i64, tpu.core_type = #tpu.core_type<tc>, window_params = [{transform_indices = @transform_0, window_bounds = array<i64: 2, 3, 128>}, {pipeline_mode = #tpu.pipeline_mode<synchronous>, transform_indices = @transform_1, window_bounds = array<i64: 1, 128>}, {pipeline_mode = #tpu.pipeline_mode<synchronous>, transform_indices = @transform_2, window_bounds = array<i64: 8, 3>}, {pipeline_mode = #tpu.pipeline_mode<synchronous>, transform_indices = @transform_3, window_bounds = array<i64: 8, 8>}, {pipeline_mode = #tpu.pipeline_mode<synchronous>, transform_indices = @transform_4, window_bounds = array<i64: 8, 3>}, {transform_indices = @transform_5, window_bounds = array<i64: 2, 8, 128>}]} {
    %c0 = arith.constant 0 : index
    %c0_0 = arith.constant 0 : index
    %0 = vector.load %arg2[%c0, %c0_0] : memref<1x128xf32, #tpu.memory_space<vmem>>, vector<1x128xf32>
    %c0_1 = arith.constant 0 : index
    %c0_2 = arith.constant 0 : index
    %1 = vector.load %arg3[%c0_1, %c0_2] : memref<8x3xf32, #tpu.memory_space<vmem>>, vector<8x3xf32>
    %c0_3 = arith.constant 0 : index
    %c0_4 = arith.constant 0 : index
    %2 = vector.load %arg4[%c0_3, %c0_4] : memref<8x8xf32, #tpu.memory_space<vmem>>, vector<8x8xf32>
    %c0_5 = arith.constant 0 : index
    %c0_6 = arith.constant 0 : index
    %3 = vector.load %arg5[%c0_5, %c0_6] : memref<8x3xf32, #tpu.memory_space<vmem>>, vector<8x3xf32>
    %4 = vector.extract_strided_slice %3 {offsets = [0, 0], sizes = [8, 1], strides = [1, 1]} : vector<8x3xf32> to vector<8x1xf32>
    %5 = vector.extract_strided_slice %3 {offsets = [0, 1], sizes = [8, 1], strides = [1, 1]} : vector<8x3xf32> to vector<8x1xf32>
    %6 = vector.extract_strided_slice %3 {offsets = [0, 2], sizes = [8, 1], strides = [1, 1]} : vector<8x3xf32> to vector<8x1xf32>
    %c0_7 = arith.constant 0 : index
    %c0_8 = arith.constant 0 : index
    %c0_9 = arith.constant 0 : index
    %7 = vector.load %arg1[%c0_7, %c0_8, %c0_9] : memref<2x3x128xf32, #tpu.memory_space<vmem>>, vector<1x3x128xf32>
    %8 = vector.shape_cast %7 : vector<1x3x128xf32> to vector<3x128xf32>
    %cst = arith.constant dense<0.000000e+00> : vector<8x128xf32>
    %9 = tpu.matmul %1, %8, %cst {dimension_numbers = #tpu.dot_dimension_numbers<[1], [0], [0], [1], [0, 0, 1, 1], [], []>} : vector<8x3xf32>, vector<3x128xf32>, vector<8x128xf32> -> vector<8x128xf32>
    %10 = vector.broadcast %5 : vector<8x1xf32> to vector<8x128xf32>
    %11 = arith.addf %9, %10 : vector<8x128xf32>
    %12 = vector.broadcast %4 : vector<8x1xf32> to vector<8x128xf32>
    %13 = arith.subf %12, %11 : vector<8x128xf32>
    %cst_10 = arith.constant 0.000000e+00 : f32
    %cst_11 = arith.constant 6.000000e+00 : f32
    %14 = vector.broadcast %cst_10 : f32 to vector<8x128xf32>
    %15 = arith.maximumf %14, %13 : vector<8x128xf32>
    %16 = vector.broadcast %cst_11 : f32 to vector<8x128xf32>
    %17 = arith.minimumf %16, %15 : vector<8x128xf32>
    %cst_12 = arith.constant 0.166666672 : f32
    %18 = vector.broadcast %cst_12 : f32 to vector<8x128xf32>
    %19 = arith.mulf %17, %18 : vector<8x128xf32>
    %20 = vector.broadcast %0 : vector<1x128xf32> to vector<8x128xf32>
    %21 = arith.mulf %19, %20 : vector<8x128xf32>
    %cst_13 = arith.constant dense<0.000000e+00> : vector<8x128xf32>
    %22 = tpu.matmul %2, %21, %cst_13 {dimension_numbers = #tpu.dot_dimension_numbers<[1], [0], [0], [1], [0, 0, 1, 1], [], []>} : vector<8x8xf32>, vector<8x128xf32>, vector<8x128xf32> -> vector<8x128xf32>
    %23 = vector.broadcast %6 : vector<8x1xf32> to vector<8x128xf32>
    %24 = arith.addf %22, %23 : vector<8x128xf32>
    %25 = vector.broadcast %4 : vector<8x1xf32> to vector<8x128xf32>
    %26 = arith.subf %25, %24 : vector<8x128xf32>
    %cst_14 = arith.constant 0.000000e+00 : f32
    %cst_15 = arith.constant 6.000000e+00 : f32
    %27 = vector.broadcast %cst_14 : f32 to vector<8x128xf32>
    %28 = arith.maximumf %27, %26 : vector<8x128xf32>
    %29 = vector.broadcast %cst_15 : f32 to vector<8x128xf32>
    %30 = arith.minimumf %29, %28 : vector<8x128xf32>
    %cst_16 = arith.constant 0.166666672 : f32
    %31 = vector.broadcast %cst_16 : f32 to vector<8x128xf32>
    %32 = arith.mulf %30, %31 : vector<8x128xf32>
    %c0_17 = arith.constant 0 : index
    %c0_18 = arith.constant 0 : index
    %c0_19 = arith.constant 0 : index
    %33 = vector.load %arg6[%c0_17, %c0_18, %c0_19] : memref<2x8x128xf32, #tpu.memory_space<vmem>>, vector<1x8x128xf32>
    %34 = vector.shape_cast %33 : vector<1x8x128xf32> to vector<8x128xf32>
    %35 = vector.shape_cast %32 : vector<8x128xf32> to vector<1x8x128xf32>
    tpu.vector_store %arg6[%c0_17, %c0_18, %c0_19], %35 {strides = array<i32>} : memref<2x8x128xf32, #tpu.memory_space<vmem>>, vector<1x8x128xf32>,
    %c1 = arith.constant 1 : index
    %c0_20 = arith.constant 0 : index
    %c0_21 = arith.constant 0 : index
    %36 = vector.load %arg1[%c1, %c0_20, %c0_21] : memref<2x3x128xf32, #tpu.memory_space<vmem>>, vector<1x3x128xf32>
    %37 = vector.shape_cast %36 : vector<1x3x128xf32> to vector<3x128xf32>
    %cst_22 = arith.constant dense<0.000000e+00> : vector<8x128xf32>
    %38 = tpu.matmul %1, %37, %cst_22 {dimension_numbers = #tpu.dot_dimension_numbers<[1], [0], [0], [1], [0, 0, 1, 1], [], []>} : vector<8x3xf32>, vector<3x128xf32>, vector<8x128xf32> -> vector<8x128xf32>
    %39 = vector.broadcast %5 : vector<8x1xf32> to vector<8x128xf32>
    %40 = arith.addf %38, %39 : vector<8x128xf32>
    %41 = vector.broadcast %4 : vector<8x1xf32> to vector<8x128xf32>
    %42 = arith.subf %41, %40 : vector<8x128xf32>
    %cst_23 = arith.constant 0.000000e+00 : f32
    %cst_24 = arith.constant 6.000000e+00 : f32
    %43 = vector.broadcast %cst_23 : f32 to vector<8x128xf32>
    %44 = arith.maximumf %43, %42 : vector<8x128xf32>
    %45 = vector.broadcast %cst_24 : f32 to vector<8x128xf32>
    %46 = arith.minimumf %45, %44 : vector<8x128xf32>
    %cst_25 = arith.constant 0.166666672 : f32
    %47 = vector.broadcast %cst_25 : f32 to vector<8x128xf32>
    %48 = arith.mulf %46, %47 : vector<8x128xf32>
    %49 = vector.broadcast %0 : vector<1x128xf32> to vector<8x128xf32>
    %50 = arith.mulf %48, %49 : vector<8x128xf32>
    %cst_26 = arith.constant dense<0.000000e+00> : vector<8x128xf32>
    %51 = tpu.matmul %2, %50, %cst_26 {dimension_numbers = #tpu.dot_dimension_numbers<[1], [0], [0], [1], [0, 0, 1, 1], [], []>} : vector<8x8xf32>, vector<8x128xf32>, vector<8x128xf32> -> vector<8x128xf32>
    %52 = vector.broadcast %6 : vector<8x1xf32> to vector<8x128xf32>
    %53 = arith.addf %51, %52 : vector<8x128xf32>
    %54 = vector.broadcast %4 : vector<8x1xf32> to vector<8x128xf32>
    %55 = arith.subf %54, %53 : vector<8x128xf32>
    %cst_27 = arith.constant 0.000000e+00 : f32
    %cst_28 = arith.constant 6.000000e+00 : f32
    %56 = vector.broadcast %cst_27 : f32 to vector<8x128xf32>
    %57 = arith.maximumf %56, %55 : vector<8x128xf32>
    %58 = vector.broadcast %cst_28 : f32 to vector<8x128xf32>
    %59 = arith.minimumf %58, %57 : vector<8x128xf32>
    %cst_29 = arith.constant 0.166666672 : f32
    %60 = vector.broadcast %cst_29 : f32 to vector<8x128xf32>
    %61 = arith.mulf %59, %60 : vector<8x128xf32>
    %c1_30 = arith.constant 1 : index
    %c0_31 = arith.constant 0 : index
    %c0_32 = arith.constant 0 : index
    %62 = vector.load %arg6[%c1_30, %c0_31, %c0_32] : memref<2x8x128xf32, #tpu.memory_space<vmem>>, vector<1x8x128xf32>
    %63 = vector.shape_cast %62 : vector<1x8x128xf32> to vector<8x128xf32>
    %64 = vector.shape_cast %61 : vector<8x128xf32> to vector<1x8x128xf32>
    tpu.vector_store %arg6[%c1_30, %c0_31, %c0_32], %64 {strides = array<i32>} : memref<2x8x128xf32, #tpu.memory_space<vmem>>, vector<1x8x128xf32>,
    return
  }
  func.func @transform_0(%arg0: i32) -> (i32, i32, i32) {
    %c0_i32 = arith.constant 0 : i32
    %c0_i32_0 = arith.constant 0 : i32
    %c0_i32_1 = arith.constant 0 : i32
    return %arg0, %c0_i32, %c0_i32_0 : i32, i32, i32
  }
  func.func @transform_1(%arg0: i32) -> (i32, i32) {
    %c0_i32 = arith.constant 0 : i32
    %c0_i32_0 = arith.constant 0 : i32
    %c0_i32_1 = arith.constant 0 : i32
    return %c0_i32, %c0_i32_0 : i32, i32
  }
  func.func @transform_2(%arg0: i32) -> (i32, i32) {
    %c0_i32 = arith.constant 0 : i32
    %c0_i32_0 = arith.constant 0 : i32
    %c0_i32_1 = arith.constant 0 : i32
    return %c0_i32, %c0_i32_0 : i32, i32
  }
  func.func @transform_3(%arg0: i32) -> (i32, i32) {
    %c0_i32 = arith.constant 0 : i32
    %c0_i32_0 = arith.constant 0 : i32
    %c0_i32_1 = arith.constant 0 : i32
    return %c0_i32, %c0_i32_0 : i32, i32
  }
  func.func @transform_4(%arg0: i32) -> (i32, i32) {
    %c0_i32 = arith.constant 0 : i32
    %c0_i32_0 = arith.constant 0 : i32
    %c0_i32_1 = arith.constant 0 : i32
    return %c0_i32, %c0_i32_0 : i32, i32
  }
  func.func @transform_5(%arg0: i32) -> (i32, i32, i32) {
    %c0_i32 = arith.constant 0 : i32
    %c0_i32_0 = arith.constant 0 : i32
    %c0_i32_1 = arith.constant 0 : i32
    return %arg0, %c0_i32, %c0_i32_0 : i32, i32, i32
  }
}

</mosaic_0001>

<bundles_post_ra>
// kernel: model_forward.1
= control target key start
LH: loop header
LB: loop body
LE: loop exit
PB: predicated region body
PF: predicated region fallthrough
CT: control target
= control target key end

     0   :  { %vm34_vm0 = vcmask 1042432   ;;  %vm30_vm1 = vcmask 23552   ;;  %v412_v0 = vmov 0.0   ;;  %vm413_vm2 = vmmov 0   ;;  %s479_s0 = inlined_call_operand.vmem [shape: f32[2,3,128], index: 0, kind: input, shape index: {}]   ;;  %s480_s2 = inlined_call_operand.vmem [shape: f32[8,3], index: 2, kind: input, shape index: {}]   ;;  %s481_s4 = inlined_call_operand.vmem [shape: f32[8,3], index: 4, kind: input, shape index: {}]   ;;  %s482_s1 = inlined_call_operand.vmem [shape: f32[1,128], index: 1, kind: input, shape index: {}]   ;;  %s483_s3 = inlined_call_operand.vmem [shape: f32[8,8], index: 3, kind: input, shape index: {}]   ;;  %s484_s5 = inlined_call_operand.vmem [shape: f32[2,8,128], index: 5, kind: output, shape index: {}]  }
   0x1   :  { %383 = vmatprep.subr.mxu0 %v412_v0  ;;  %v24_v1 = vld [vmem:[%s479_s0] sm:$0x7]  ;;  %v370_v2 = vld [vmem:[%s479_s0 + $0x4] sm:$0x7]  ;;  %385 = vmatprep.mubr.msk.f32.mxu0 %vm413_vm2, %v412_v0  ;;  %v414_v4 = vmov 1   ;;  %v415_v6 = vmov 0  }
   0x2   :  { %v21_v3 = vld [vmem:[%s480_s2] sm:$0xff]  ;;  %384 = vmatpush3.msk.msra.mxu0 %vm34_vm0, %v24_v1  ;;  %408 = vset.pattern.permute.xlu0 %v414_v4  ;;  %v416_v7 = vmov 2   ;;  %vm127_vm3 = vcmask 64512  }
   0x3   :  { %v23_v5 = vld [vmem:[%s481_s4] sm:$0xff]  ;;  %386 = vmatmul.mubr.msk.f32.vlgmr.msra.gmra.mrb[0].mxu0 %vm30_vm1, %v21_v3  ;;  %393 = vmatprep.subr.mxu0 %v412_v0 }
   0x4   :  { %394 = vmatpush3.msk.msra.mxu0 %vm34_vm0, %v370_v2  ;;  %395 = vmatprep.mubr.msk.f32.mxu0 %vm413_vm2, %v412_v0  ;;  %v368_v20 = vld [vmem:[%s482_s1] ss:$0 sm:$0xff] }
   0x5   :  { %27 = vperm.xlu0 %408, %v23_v5   ;;  %388 = vmatprep.subr.mxu1 %v412_v0  ;;  %v22_v25 = vld [vmem:[%s483_s3] sm:$0xff] }
   0x6   :  { %390 = vmatprep.mubr.msk.f32.mxu1 %vm413_vm2, %v412_v0  ;;  %410 = vset.pattern.permute.xlu1 %v416_v7 }
   0x7   :  { %396 = vmatmul.mubr.msk.f32.vlgmr.msra.gmra.mrb[2].mxu0 %vm30_vm1, %v21_v3  ;;  %124 = vperm.xlu1 %410, %v23_v5  }
   0x9   :  { %409 = vset.pattern.permute.xlu0 %v415_v6 }
   0xa   :  { %109 = vperm.xlu0 %409, %v23_v5  }
   0xe   :  { %411 = vset.pattern.permute.xlu0 %v416_v7 }
  0x84   :  { %v28_v8 = vpop.permute.xlu0 %27 }
  0x86   :  { %v125_v28 = vpop.permute.xlu1 %124 }
  0x89   :  { %v110_v10 = vpop.permute.xlu0 %109 }
  0xd6   :  { %v104_v9 = vpop.f32.mrb[0].mxu0 }
  0xd7   :  { %v105_v11 = vadd.f32 %v104_v9, %v28_v8  ;;  %v387_v12 = vpop.f32.mrb[1].mxu0 }
  0xd9   :  { %v112_v13 = vsub.f32 %v110_v10, %v105_v11 }
  0xda   :  { %v277_v14 = vpop.f32.mrb[2].mxu0 }
  0xdb   :  { %v113_v15 = vmax.f32 %v112_v13, 0.0  ;;  %v278_v16 = vadd.f32 %v277_v14, %v28_v8  ;;  %v397_v17 = vpop.f32.mrb[3].mxu0 }
  0xdd   :  { %v281_v18 = vsub.f32 %v110_v10, %v278_v16  ;;  %v114_v19 = vmin.f32 %v113_v15, 6.0 }
  0xdf   :  { %v282_v21 = vmax.f32 %v281_v18, 0.0  ;;  %v115_v22 = vmul.f32 0.16666667, %v114_v19 }
  0xe1   :  { %v283_v23 = vmin.f32 %v282_v21, 6.0  ;;  %v122_v24 = vmul.f32 %v368_v20, %v115_v22 }
  0xe3   :  { %v284_v26 = vmul.f32 0.16666667, %v283_v23  ;;  %389 = vmatpush3.msra.mxu1 %v122_v24 }
  0xe4   :  { %391 = vmatmul.mubr.msk.f32.vlgmr.msra.gmra.mrb[0].mxu1 %vm127_vm3, %v22_v25  ;;  %398 = vmatprep.subr.mxu1 %v412_v0 }
  0xe5   :  { %v285_v27 = vmul.f32 %v368_v20, %v284_v26  ;;  %400 = vmatprep.mubr.msk.f32.mxu1 %vm413_vm2, %v412_v0 }
  0xe7   :  { %399 = vmatpush3.msra.mxu1 %v285_v27 }
  0xe8   :  { %401 = vmatmul.mubr.msk.f32.vlgmr.msra.gmra.mrb[2].mxu1 %vm127_vm3, %v22_v25 }
 0x1b7   :  { %v197_v29 = vpop.f32.mrb[0].mxu1 }
 0x1b8   :  { %v198_v30 = vadd.f32 %v197_v29, %v125_v28  ;;  %v392_v31 = vpop.f32.mrb[1].mxu1 }
 0x1ba   :  { %v201_v32 = vsub.f32 %v110_v10, %v198_v30 }
 0x1bb   :  { %v352_v33 = vpop.f32.mrb[2].mxu1 }
 0x1bc   :  { %v202_v34 = vmax.f32 %v201_v32, 0.0  ;;  %v353_v35 = vadd.f32 %v352_v33, %v125_v28  ;;  %v402_v36 = vpop.f32.mrb[3].mxu1 }
 0x1be   :  { %v203_v37 = vmin.f32 %v202_v34, 6.0  ;;  %v356_v38 = vsub.f32 %v110_v10, %v353_v35 }
 0x1c0   :  { %v204_v39 = vmul.f32 0.16666667, %v203_v37  ;;  %v357_v40 = vmax.f32 %v356_v38, 0.0 }
 0x1c2   :  { %205 = vst [vmem:[%s484_s5] sm:$0xff] %v204_v39  ;;  %v358_v41 = vmin.f32 %v357_v40, 6.0 }
 0x1c4   :  { %v359_v42 = vmul.f32 0.16666667, %v358_v41 }
 0x1c6   :  { %374 = vst [vmem:[%s484_s5 + $0x8] sm:$0xff] %v359_v42 }

</bundles_post_ra>
